<compile_context>
chip_gen: v5e
topology: v5e:2x2
jax: 0.10.0
libtpu: 0.0.40
codegen_flags: <defaults>
</compile_context>

<pallas_src>
import functools

import jax
import jax.numpy as jnp
from jax import lax
from jax.experimental import pallas as pl
from jax.experimental.pallas import tpu as pltpu

INPUT_DIM = 2
HIDDEN_DIM1 = 10
HIDDEN_DIM2 = 10
OUTPUT_DIM = 4

_LANE = 128
_MAX_CHUNK = 1024  # lane-chunk for the in-kernel loop (bounds h1/h2 live range)


def _round_up(n, m):
    return ((n + m - 1) // m) * m


def _cdiv(a, b):
    return (a + b - 1) // b


def _mlp_kernel(x_ref, w1_ref, b1_ref, w2_ref, b2_ref, w3_ref, b3_ref, o_ref,
                *, chunk):
    # x_ref : (INPUT_DIM, TILE_B)   -- batch on the lane axis (lane-dense)
    # wN_ref: (fan_out, fan_in)     -- PyTorch layout, VMEM-resident
    # bN_ref: (fan_out, 1)          -- broadcasts over lanes
    # o_ref : (OUTPUT_DIM, TILE_B)  -- lane-dense store
    w1 = w1_ref[...].astype(jnp.float32)
    b1 = b1_ref[...].astype(jnp.float32)
    w2 = w2_ref[...].astype(jnp.float32)
    b2 = b2_ref[...].astype(jnp.float32)
    w3 = w3_ref[...].astype(jnp.float32)
    b3 = b3_ref[...].astype(jnp.float32)
    w1c0 = w1[:, 0:1]
    w1c1 = w1[:, 1:2]

    tile_b = x_ref.shape[-1]
    n_chunks = tile_b // chunk  # static

    def compute_chunk(start):
        x = x_ref[:, pl.ds(start, chunk)].astype(jnp.float32)      # (2, chunk)
        # fc1: K = 2 -> two VPU broadcast FMAs, no MXU round trip.
        h1 = jnp.maximum(b1 + w1c0 * x[0:1, :] + w1c1 * x[1:2, :], 0.0)
        # fc2 / fc3: MXU matmuls with f32 accumulation.
        h2 = jnp.dot(w2, h1, preferred_element_type=jnp.float32) + b2
        h2 = jnp.maximum(h2, 0.0)
        out = jnp.dot(w3, h2, preferred_element_type=jnp.float32) + b3
        o_ref[:, pl.ds(start, chunk)] = out.astype(o_ref.dtype)

    if n_chunks == 1:
        # Static slice path (covers the whole tile).
        compute_chunk(0)
    else:
        # Chunked loop bounds h1/h2 to [10, chunk] f32 (no [10, tile_b] spills).
        def body(c, carry):
            compute_chunk(pl.multiple_of(c * chunk, _LANE))
            return carry

        lax.fori_loop(0, n_chunks, body, None)


def feedforward_nn_feature_major(x_fm, w1, b1, w2, b2, w3, b3, *, tile_b=65536):
    """Feature-major entry point (no wrapper transpose HBM passes).

    x_fm: [INPUT_DIM, batch]; weights PyTorch-layout [fan_out, fan_in];
    biases [fan_out, 1].  Returns [OUTPUT_DIM, batch].
    """
    in_dim, batch = x_fm.shape
    assert in_dim == INPUT_DIM
    out_dtype = x_fm.dtype

    # Pad batch only to lane alignment (multiple of 128), NOT to the tile.
    padded = _round_up(batch, _LANE)

    # Batch tile: as large as requested, capped at the lane-aligned batch, and
    # (when there is enough work) at ~half of it so the grid has >=2 steps for
    # v7x's two TensorCores.  Always a multiple of 128.
    tb = min(int(tile_b), padded)
    if padded >= 2 * _LANE:
        tb = min(tb, _round_up(_cdiv(padded, 2), _LANE))
    tb = _round_up(tb, _LANE)

    # Lane-chunk: largest multiple of 128 that divides the tile and is <= 1024.
    m = tb // _LANE
    max_d = min(m, _MAX_CHUNK // _LANE)
    d = next(dd for dd in range(max_d, 0, -1) if m % dd == 0)
    chunk = d * _LANE

    grid = (_cdiv(padded, tb),)  # last block may be partial; Pallas masks it

    if padded != batch:
        x_fm = jnp.pad(x_fm, ((0, 0), (0, padded - batch)))

    itemsize = jnp.dtype(out_dtype).itemsize
    flops = 2 * padded * (INPUT_DIM * HIDDEN_DIM1
                          + HIDDEN_DIM1 * HIDDEN_DIM2
                          + HIDDEN_DIM2 * OUTPUT_DIM)
    param_bytes = 4 * (HIDDEN_DIM1 * (INPUT_DIM + 1)
                       + HIDDEN_DIM2 * (HIDDEN_DIM1 + 1)
                       + OUTPUT_DIM * (HIDDEN_DIM2 + 1))
    bytes_accessed = int(padded * (INPUT_DIM + OUTPUT_DIM) * itemsize
                         + param_bytes)

    # VMEM budget: double-buffered x + out blocks (weights are negligible,
    # chunked intermediates are bounded).  Floor 16 MiB, cap 48 MiB (v7x-safe).
    block_bytes = (INPUT_DIM + OUTPUT_DIM) * tb * itemsize
    vmem_limit = int(min(max(4 * block_bytes + (4 << 20), 16 << 20), 48 << 20))

    resident = lambda i: (0, 0)  # same block every step -> DMA'd once, stays in VMEM

    kernel = functools.partial(_mlp_kernel, chunk=chunk)

    out_fm = pl.pallas_call(
        kernel,
        out_shape=jax.ShapeDtypeStruct((OUTPUT_DIM, padded), out_dtype),
        grid=grid,
        in_specs=[
            pl.BlockSpec((INPUT_DIM, tb), lambda i: (0, i)),
            pl.BlockSpec((HIDDEN_DIM1, INPUT_DIM), resident),
            pl.BlockSpec((HIDDEN_DIM1, 1), resident),
            pl.BlockSpec((HIDDEN_DIM2, HIDDEN_DIM1), resident),
            pl.BlockSpec((HIDDEN_DIM2, 1), resident),
            pl.BlockSpec((OUTPUT_DIM, HIDDEN_DIM2), resident),
            pl.BlockSpec((OUTPUT_DIM, 1), resident),
        ],
        out_specs=pl.BlockSpec((OUTPUT_DIM, tb), lambda i: (0, i)),
        compiler_params=pltpu.CompilerParams(
            dimension_semantics=("parallel",),
            vmem_limit_bytes=vmem_limit),
        cost_estimate=pl.CostEstimate(
            flops=flops, transcendentals=0, bytes_accessed=bytes_accessed),
    )(x_fm, w1, b1, w2, b2, w3, b3)

    return out_fm[:, :batch] if padded != batch else out_fm


def feedforward_nn(x, w1, b1, w2, b2, w3, b3, *, tile_b=65536):
    """Batch-major convenience wrapper matching the PyTorch contract.

    x: [batch, INPUT_DIM] -> [batch, OUTPUT_DIM].  The transposes here are
    layout plumbing; callers that can hold activations feature-major should
    use feedforward_nn_feature_major directly to avoid the extra HBM passes.
    """
    out_fm = feedforward_nn_feature_major(x.T, w1, b1, w2, b2, w3, b3,
                                          tile_b=tile_b)
    return out_fm.T


def init_params(key):
    # Deterministic init mimicking torch.nn.Linear defaults:
    # U(-1/sqrt(fan_in), 1/sqrt(fan_in)) for weight and bias.
    def linear(k, fan_in, fan_out):
        kw, kb = jax.random.split(k)
        bound = 1.0 / (fan_in ** 0.5)
        w = jax.random.uniform(kw, (fan_out, fan_in), jnp.float32, -bound, bound)
        b = jax.random.uniform(kb, (fan_out, 1), jnp.float32, -bound, bound)
        return w, b

    k1, k2, k3 = jax.random.split(key, 3)
    w1, b1 = linear(k1, INPUT_DIM, HIDDEN_DIM1)
    w2, b2 = linear(k2, HIDDEN_DIM1, HIDDEN_DIM2)
    w3, b3 = linear(k3, HIDDEN_DIM2, OUTPUT_DIM)
    return w1, b1, w2, b2, w3, b3


def _reference(x, w1, b1, w2, b2, w3, b3):
    h = jnp.maximum(x @ w1.T + b1.T, 0.0)
    h = jnp.maximum(h @ w2.T + b2.T, 0.0)
    return h @ w3.T + b3.T


if __name__ == "__main__":
    key = jax.random.PRNGKey(0)
    kx, kp = jax.random.split(key)
    params = init_params(kp)

    # Small demo batch (single tile, single chunk), batch-major contract.
    batch = 8
    x = jax.random.normal(kx, (batch, INPUT_DIM), dtype=jnp.float32)
    out = jax.block_until_ready(feedforward_nn(x, *params))
    ref = _reference(x, *params)
    assert out.shape == (batch, OUTPUT_DIM)
    assert jnp.allclose(out, ref, atol=1e-4, rtol=1e-4), \
        float(jnp.max(jnp.abs(out - ref)))

    # Feature-major entry point (no wrapper transposes), non-lane-aligned
    # batch: exercises 2 grid steps with a masked partial last block.
    batch2 = 300
    x2 = jax.random.normal(jax.random.PRNGKey(1), (batch2, INPUT_DIM),
                           dtype=jnp.float32)
    out2_fm = jax.block_until_ready(
        feedforward_nn_feature_major(x2.T, *params))
    ref2 = _reference(x2, *params)
    assert out2_fm.shape == (OUTPUT_DIM, batch2)
    assert jnp.allclose(out2_fm.T, ref2, atol=1e-4, rtol=1e-4), \
        float(jnp.max(jnp.abs(out2_fm.T - ref2)))

    # Larger batch: 2 grid steps x 2 lane-chunks per tile (fori_loop path).
    batch3 = 4000
    x3 = jax.random.normal(jax.random.PRNGKey(2), (batch3, INPUT_DIM),
                           dtype=jnp.float32)
    out3 = jax.block_until_ready(feedforward_nn(x3, *params))
    ref3 = _reference(x3, *params)
    assert out3.shape == (batch3, OUTPUT_DIM)
    assert jnp.allclose(out3, ref3, atol=1e-4, rtol=1e-4), \
        float(jnp.max(jnp.abs(out3 - ref3)))

    print("KERNEL_OK")
</pallas_src>

<mosaic_0001>
module attributes {stable_mosaic.version = 11 : i64} {
  func.func @_mlp_kernel(%arg0: i32, %arg1: memref<2x128xf32, #tpu.memory_space<vmem>>, %arg2: memref<10x2xf32, #tpu.memory_space<vmem>>, %arg3: memref<10x1xf32, #tpu.memory_space<vmem>>, %arg4: memref<10x10xf32, #tpu.memory_space<vmem>>, %arg5: memref<10x1xf32, #tpu.memory_space<vmem>>, %arg6: memref<4x10xf32, #tpu.memory_space<vmem>>, %arg7: memref<4x1xf32, #tpu.memory_space<vmem>>, %arg8: memref<4x128xf32, #tpu.memory_space<vmem>>) attributes {dimension_semantics = [#tpu.dimension_semantics<parallel>], iteration_bounds = array<i64: 1>, scalar_prefetch = 0 : i64, scratch_operands = 0 : i64, tpu.core_type = #tpu.core_type<tc>, window_params = [{transform_indices = @transform_0, window_bounds = array<i64: 2, 128>}, {pipeline_mode = #tpu.pipeline_mode<synchronous>, transform_indices = @transform_1, window_bounds = array<i64: 10, 2>}, {pipeline_mode = #tpu.pipeline_mode<synchronous>, transform_indices = @transform_2, window_bounds = array<i64: 10, 1>}, {pipeline_mode = #tpu.pipeline_mode<synchronous>, transform_indices = @transform_3, window_bounds = array<i64: 10, 10>}, {pipeline_mode = #tpu.pipeline_mode<synchronous>, transform_indices = @transform_4, window_bounds = array<i64: 10, 1>}, {pipeline_mode = #tpu.pipeline_mode<synchronous>, transform_indices = @transform_5, window_bounds = array<i64: 4, 10>}, {pipeline_mode = #tpu.pipeline_mode<synchronous>, transform_indices = @transform_6, window_bounds = array<i64: 4, 1>}, {transform_indices = @transform_7, window_bounds = array<i64: 4, 128>}]} {
    %c0 = arith.constant 0 : index
    %c0_0 = arith.constant 0 : index
    %0 = vector.load %arg2[%c0, %c0_0] : memref<10x2xf32, #tpu.memory_space<vmem>>, vector<10x2xf32>
    %c0_1 = arith.constant 0 : index
    %c0_2 = arith.constant 0 : index
    %1 = vector.load %arg3[%c0_1, %c0_2] : memref<10x1xf32, #tpu.memory_space<vmem>>, vector<10x1xf32>
    %c0_3 = arith.constant 0 : index
    %c0_4 = arith.constant 0 : index
    %2 = vector.load %arg4[%c0_3, %c0_4] : memref<10x10xf32, #tpu.memory_space<vmem>>, vector<10x10xf32>
    %c0_5 = arith.constant 0 : index
    %c0_6 = arith.constant 0 : index
    %3 = vector.load %arg5[%c0_5, %c0_6] : memref<10x1xf32, #tpu.memory_space<vmem>>, vector<10x1xf32>
    %c0_7 = arith.constant 0 : index
    %c0_8 = arith.constant 0 : index
    %4 = vector.load %arg6[%c0_7, %c0_8] : memref<4x10xf32, #tpu.memory_space<vmem>>, vector<4x10xf32>
    %c0_9 = arith.constant 0 : index
    %c0_10 = arith.constant 0 : index
    %5 = vector.load %arg7[%c0_9, %c0_10] : memref<4x1xf32, #tpu.memory_space<vmem>>, vector<4x1xf32>
    %6 = vector.extract_strided_slice %0 {offsets = [0, 0], sizes = [10, 1], strides = [1, 1]} : vector<10x2xf32> to vector<10x1xf32>
    %7 = vector.extract_strided_slice %0 {offsets = [0, 1], sizes = [10, 1], strides = [1, 1]} : vector<10x2xf32> to vector<10x1xf32>
    %c0_11 = arith.constant 0 : index
    %c0_12 = arith.constant 0 : index
    %8 = vector.load %arg1[%c0_11, %c0_12] : memref<2x128xf32, #tpu.memory_space<vmem>>, vector<2x128xf32>
    %9 = vector.extract_strided_slice %8 {offsets = [0, 0], sizes = [1, 128], strides = [1, 1]} : vector<2x128xf32> to vector<1x128xf32>
    %10 = vector.broadcast %6 : vector<10x1xf32> to vector<10x128xf32>
    %11 = vector.broadcast %9 : vector<1x128xf32> to vector<10x128xf32>
    %12 = arith.mulf %10, %11 : vector<10x128xf32>
    %13 = vector.broadcast %1 : vector<10x1xf32> to vector<10x128xf32>
    %14 = arith.addf %13, %12 : vector<10x128xf32>
    %15 = vector.extract_strided_slice %8 {offsets = [1, 0], sizes = [1, 128], strides = [1, 1]} : vector<2x128xf32> to vector<1x128xf32>
    %16 = vector.broadcast %7 : vector<10x1xf32> to vector<10x128xf32>
    %17 = vector.broadcast %15 : vector<1x128xf32> to vector<10x128xf32>
    %18 = arith.mulf %16, %17 : vector<10x128xf32>
    %19 = arith.addf %14, %18 : vector<10x128xf32>
    %cst = arith.constant 0.000000e+00 : f32
    %20 = vector.broadcast %cst : f32 to vector<10x128xf32>
    %21 = arith.maximumf %19, %20 : vector<10x128xf32>
    %cst_13 = arith.constant dense<0.000000e+00> : vector<10x128xf32>
    %22 = tpu.matmul %2, %21, %cst_13 {dimension_numbers = #tpu.dot_dimension_numbers<[1], [0], [0], [1], [0, 0, 1, 1], [], []>} : vector<10x10xf32>, vector<10x128xf32>, vector<10x128xf32> -> vector<10x128xf32>
    %23 = vector.broadcast %3 : vector<10x1xf32> to vector<10x128xf32>
    %24 = arith.addf %22, %23 : vector<10x128xf32>
    %cst_14 = arith.constant 0.000000e+00 : f32
    %25 = vector.broadcast %cst_14 : f32 to vector<10x128xf32>
    %26 = arith.maximumf %24, %25 : vector<10x128xf32>
    %cst_15 = arith.constant dense<0.000000e+00> : vector<4x128xf32>
    %27 = tpu.matmul %4, %26, %cst_15 {dimension_numbers = #tpu.dot_dimension_numbers<[1], [0], [0], [1], [0, 0, 1, 1], [], []>} : vector<4x10xf32>, vector<10x128xf32>, vector<4x128xf32> -> vector<4x128xf32>
    %28 = vector.broadcast %5 : vector<4x1xf32> to vector<4x128xf32>
    %29 = arith.addf %27, %28 : vector<4x128xf32>
    %c0_16 = arith.constant 0 : index
    %c0_17 = arith.constant 0 : index
    %30 = vector.load %arg8[%c0_16, %c0_17] : memref<4x128xf32, #tpu.memory_space<vmem>>, vector<4x128xf32>
    tpu.vector_store %arg8[%c0_16, %c0_17], %29 {strides = array<i32>} : memref<4x128xf32, #tpu.memory_space<vmem>>, vector<4x128xf32>,
    return
  }
  func.func @transform_0(%arg0: i32) -> (i32, i32) {
    %c0_i32 = arith.constant 0 : i32
    %c0_i32_0 = arith.constant 0 : i32
    return %c0_i32, %arg0 : i32, i32
  }
  func.func @transform_1(%arg0: i32) -> (i32, i32) {
    %c0_i32 = arith.constant 0 : i32
    %c0_i32_0 = arith.constant 0 : i32
    %c0_i32_1 = arith.constant 0 : i32
    return %c0_i32, %c0_i32_0 : i32, i32
  }
  func.func @transform_2(%arg0: i32) -> (i32, i32) {
    %c0_i32 = arith.constant 0 : i32
    %c0_i32_0 = arith.constant 0 : i32
    %c0_i32_1 = arith.constant 0 : i32
    return %c0_i32, %c0_i32_0 : i32, i32
  }
  func.func @transform_3(%arg0: i32) -> (i32, i32) {
    %c0_i32 = arith.constant 0 : i32
    %c0_i32_0 = arith.constant 0 : i32
    %c0_i32_1 = arith.constant 0 : i32
    return %c0_i32, %c0_i32_0 : i32, i32
  }
  func.func @transform_4(%arg0: i32) -> (i32, i32) {
    %c0_i32 = arith.constant 0 : i32
    %c0_i32_0 = arith.constant 0 : i32
    %c0_i32_1 = arith.constant 0 : i32
    return %c0_i32, %c0_i32_0 : i32, i32
  }
  func.func @transform_5(%arg0: i32) -> (i32, i32) {
    %c0_i32 = arith.constant 0 : i32
    %c0_i32_0 = arith.constant 0 : i32
    %c0_i32_1 = arith.constant 0 : i32
    return %c0_i32, %c0_i32_0 : i32, i32
  }
  func.func @transform_6(%arg0: i32) -> (i32, i32) {
    %c0_i32 = arith.constant 0 : i32
    %c0_i32_0 = arith.constant 0 : i32
    %c0_i32_1 = arith.constant 0 : i32
    return %c0_i32, %c0_i32_0 : i32, i32
  }
  func.func @transform_7(%arg0: i32) -> (i32, i32) {
    %c0_i32 = arith.constant 0 : i32
    %c0_i32_0 = arith.constant 0 : i32
    return %c0_i32, %arg0 : i32, i32
  }
}

</mosaic_0001>

<bundles_post_ra>
// kernel: tpu_custom_call.1
= control target key start
LH: loop header
LB: loop body
LE: loop exit
PB: predicated region body
PF: predicated region fallthrough
CT: control target
= control target key end

     0   :  { %v215_v2 = vmov 0   ;;  %s300_s0 = inlined_call_operand.vmem [shape: f32[2,128], index: 0, kind: input, shape index: {}]   ;;  %s301_s1 = inlined_call_operand.vmem [shape: f32[10,2], index: 1, kind: input, shape index: {}]   ;;  %s302_s2 = inlined_call_operand.vmem [shape: f32[10,1], index: 2, kind: input, shape index: {}]   ;;  %s303_s3 = inlined_call_operand.vmem [shape: f32[10,10], index: 3, kind: input, shape index: {}]   ;;  %s304_s4 = inlined_call_operand.vmem [shape: f32[10,1], index: 4, kind: input, shape index: {}]   ;;  %s305_s5 = inlined_call_operand.vmem [shape: f32[4,10], index: 5, kind: input, shape index: {}]   ;;  %s306_s6 = inlined_call_operand.vmem [shape: f32[4,1], index: 6, kind: input, shape index: {}]   ;;  %s307_s7 = inlined_call_operand.hbm [shape: f32[4,128], index: 7, kind: output, shape index: {}]  }
   0x1   :  { %v30_v0 = vld [vmem:[%s302_s2 + $0x8] sm:$0x3]  ;;  %183 = vset.pattern.permute.xlu1 %v215_v2  ;;  %182 = vset.pattern.permute.xlu0 %v215_v2  ;;  %v29_v3 = vld [vmem:[%s302_s2] sm:$0xff] }
   0x2   :  { %v28_v1 = vld [vmem:[%s301_s1 + $0x8] sm:$0x3]  ;;  %58 = vperm.xlu1 %183, %v30_v0  }
   0x3   :  { %45 = vperm.xlu0 %182, %v28_v1  }
   0x4   :  { %12 = vsyncpa [#allocation3], 0  ;;  %185 = vset.pattern.permute.xlu2 %v215_v2  ;;  %v27_v4 = vld [vmem:[%s301_s1] sm:$0xff]  ;;  %v216_v5 = vmov 1   ;;  %v34_v6 = vld [vmem:[%s304_s4 + $0x8] sm:$0x3] }
   0x5   :  { %53 = vperm.xlu2 %185, %v29_v3   ;;  %v33_v7 = vld [vmem:[%s304_s4] sm:$0xff]  ;;  %vm95_vm0 = vcmask 1041408   ;;  %v32_v27 = vld [vmem:[%s303_s3 + $0x8] sm:$0x3]  ;;  %vm88_vm1 = vcmask 80896   ;;  %s163_s21 = sshll.u32 %s307_s7, 4  ;;  %s164_s21 = int_to_ptr.hbm [resolvable:$true] %s163_s21 }
   0x6   :  { %v37_v9 = vld [vmem:[%s300_s0] sm:$0x3] }
   0x7   :  { %v48_v12 = vperm.slane %v37_v9, 0  ;;  %v71_v13 = vperm.slane %v37_v9, 1  ;;  %v31_v28 = vld [vmem:[%s303_s3] sm:$0xff] }
   0x8   :  { %v36_v29 = vld [vmem:[%s306_s6] sm:$0xf]  ;;  %s217_s6 = smov [#allocation2]  }
   0x9   :  { %v35_v38 = vld [vmem:[%s305_s5] sm:$0xf]  ;;  %s161_s18 = sshll.u32 %s217_s6, 4  ;;  %s162_s18 = int_to_ptr.vmem [resolvable:$true] %s161_s18 }
   0xa   :  { %184 = vset.pattern.permute.xlu1 %v216_v5 }
   0xb   :  { %40 = vperm.xlu0 %182, %v27_v4   ;;  %68 = vperm.xlu1 %184, %v28_v1  }
   0xd   :  { %186 = vset.pattern.permute.xlu2 %v216_v5 }
   0xe   :  { %64 = vperm.xlu2 %186, %v27_v4  }
  0x13   :  { %85 = vperm.xlu0 %182, %v34_v6   ;;  %187 = vset.pattern.permute.xlu1 %v215_v2 }
  0x14   :  { %80 = vperm.xlu1 %187, %v33_v7  }
  0x16   :  { %188 = vset.pattern.permute.xlu2 %v215_v2 }
  0x17   :  { %126 = vperm.xlu2 %188, %v36_v29  }
  0x5f   :  { %v54_v8 = vpop.permute.xlu2 %53 }
  0x68   :  { %v65_v15 = vpop.permute.xlu2 %64 }
  0x69   :  { %v72_v19 = vmul.f32 %v71_v13, %v65_v15 }
  0x71   :  { %v127_v39 = vpop.permute.xlu2 %126 }
  0x74   :  { %v59_v10 = vpop.permute.xlu1 %58 }
  0x75   :  { %v46_v11 = vpop.permute.xlu0 %45 }
  0x76   :  { %v50_v14 = vmul.f32 %v48_v12, %v46_v11 }
  0x78   :  { %v62_v20 = vadd.f32 %v59_v10, %v50_v14 }
  0x7d   :  { %v41_v16 = vpop.permute.xlu0 %40  ;;  %v69_v18 = vpop.permute.xlu1 %68 }
  0x7e   :  { %v49_v17 = vmul.f32 %v48_v12, %v41_v16  ;;  %v73_v21 = vmul.f32 %v71_v13, %v69_v18 }
  0x80   :  { %v61_v22 = vadd.f32 %v54_v8, %v49_v17  ;;  %v75_v23 = vadd.f32 %v73_v21, %v62_v20 }
  0x82   :  { %v74_v24 = vadd.f32 %v72_v19, %v61_v22  ;;  %v77_v25 = vmax.f32 %v75_v23, 0.0 }
  0x84   :  { %v76_v26 = vmax.f32 %v74_v24, 0.0  ;;  %172 = vmatpush.msk.msra.mxu0 %vm95_vm0, %v77_v25  ;;  %177 = vmatpush.msk.msra.mxu2 %vm95_vm0, %v77_v25 }
  0x85   :  { %v86_v33 = vpop.permute.xlu0 %85 }
  0x86   :  { %114 = vmatpush.msra.mxu0 %v76_v26  ;;  %178 = vmatpush.msra.mxu2 %v76_v26  ;;  %v81_v30 = vpop.permute.xlu1 %80 }
  0x87   :  { %174 = vmatmul.msk.f32.vlgmr.msra.gmra.mxu2 %vm88_vm1, %v32_v27  ;;  %173 = vmatmul.msk.f32.vlgmr.msra.gmra.mxu0 %vm88_vm1, %v31_v28 }
 0x104   :  { %v116_v31 = vpop.f32.mrf.mxu0 }
 0x105   :  { %v117_v32 = vadd.f32 %v116_v31, %v81_v30 }
 0x107   :  { %v122_v37 = vmax.f32 %v117_v32, 0.0 }
 0x10a   :  { %v119_v34 = vpop.f32.mrf.mxu2 }
 0x10b   :  { %v120_v35 = vadd.f32 %v119_v34, %v86_v33 }
 0x10d   :  { %v123_v36 = vmax.f32 %v120_v35, 0.0 }
 0x10f   :  { %175 = vmatpush.msk.msra.mxu1 %vm95_vm0, %v123_v36 }
 0x111   :  { %150 = vmatpush.msra.mxu1 %v122_v37 }
 0x112   :  { %176 = vmatmul.msk.f32.vlgmr.msra.gmra.mxu1 %vm88_vm1, %v35_v38 }
 0x18f   :  { %v152_v40 = vpop.f32.mrf.mxu1 }
 0x190   :  { %v153_v41 = vadd.f32 %v152_v40, %v127_v39 }
 0x192   :  { %155 = vst [vmem:[#allocation2] sm:$0xf] %v153_v41 }
 0x193   :  { %166 = dma.vmem_to_hbm [thread:$0]  %s162_s18, 64, %s164_s21, [#allocation3]  }
 0x194   :  { %213 = dma.done.wait [#allocation3], 64  }
 0x195   :  { %214 = vsyncadd [#allocation3], 4294967232 }
 0x196   :  { %171 = vsyncpa [#allocation3], 1 }

</bundles_post_ra>
